<compile_context>
chip_gen: v7x
topology: tpu7x:2x2x1
jax: 0.10.0
libtpu: 0.0.40
codegen_flags: <defaults>
</compile_context>

<pallas_src>
import jax
import jax.numpy as jnp
from jax.experimental import pallas as pl
from jax.experimental.pallas import tpu as pltpu


def _round_up(x, m):
    return (x + m - 1) // m * m


def _proj_kernel(x_ref, w_ref, b_ref, o_ref):
    # x_ref: (TM, K), w_ref: (K, E), b_ref: (1, E) f32, o_ref: (TM, E).
    acc = jnp.dot(x_ref[...], w_ref[...], preferred_element_type=jnp.float32)
    o_ref[...] = (acc + b_ref[...]).astype(o_ref.dtype)


def _pallas_patch_proj(patches, w, b, *, out_dtype, tm_max=8192):
    """patches: (M, K), w: (K, E), b: (E,) f32 -> (M, E) out_dtype."""
    M, K = patches.shape
    K2, E = w.shape
    assert K == K2
    b2 = b.reshape(1, E).astype(jnp.float32)

    # >= 2 grid steps (v7x megacore + DMA/compute overlap); TM large enough to
    # amortize the ~0.35us per-step overhead.  No wrapper-side padding: Pallas
    # clips the ragged last tile, and its garbage rows are never written back.
    n_steps = max(2, pl.cdiv(M, tm_max))
    TM = min(_round_up(pl.cdiv(M, n_steps), 8), _round_up(M, 8))
    grid = (pl.cdiv(M, TM),)

    cost = pl.CostEstimate(
        flops=2 * M * K * E,
        transcendentals=0,
        bytes_accessed=(M * K * patches.dtype.itemsize
                        + K * E * w.dtype.itemsize
                        + E * 4
                        + M * E * jnp.dtype(out_dtype).itemsize),
    )

    return pl.pallas_call(
        _proj_kernel,
        out_shape=jax.ShapeDtypeStruct((M, E), out_dtype),
        grid=grid,
        in_specs=[
            pl.BlockSpec((TM, K), lambda i: (i, 0)),   # LHS tile streams
            pl.BlockSpec((K, E), lambda i: (0, 0)),    # weight stays resident
            pl.BlockSpec((1, E), lambda i: (0, 0)),    # bias stays resident
        ],
        out_specs=pl.BlockSpec((TM, E), lambda i: (i, 0)),
        compiler_params=pltpu.CompilerParams(
            dimension_semantics=("parallel",)),
        cost_estimate=cost,
    )(patches, w, b2)


class PatchEmbedPallas:
    """2D image -> patch embedding; forward(x NCHW f32) -> (tokens, H, W)."""

    def __init__(self, patch_size=4, in_c=3, embed_dim=96, key=None,
                 compute_dtype=jnp.bfloat16):
        self.patch_size = (patch_size, patch_size)
        self.in_chans = in_c
        self.embed_dim = embed_dim
        self.compute_dtype = compute_dtype
        if key is None:
            key = jax.random.PRNGKey(0)
        kw, kb = jax.random.split(key)
        # Conv2d weight layout: (embed_dim, in_c, ph, pw), bias: (embed_dim,)
        fan_in = in_c * patch_size * patch_size
        bound = 1.0 / jnp.sqrt(fan_in)
        self.weight = jax.random.uniform(
            kw, (embed_dim, in_c, patch_size, patch_size),
            minval=-bound, maxval=bound, dtype=jnp.float32)
        self.bias = jax.random.uniform(
            kb, (embed_dim,), minval=-bound, maxval=bound, dtype=jnp.float32)
        # Weight rows reordered to a (ph, pw, C) flattening so the data-side
        # patch extraction matches; done once on a tiny array (free).
        self.w_mat = jnp.transpose(self.weight, (2, 3, 1, 0)).reshape(
            fan_in, embed_dim).astype(compute_dtype)

    def __call__(self, x):
        # x: (B, C, H, W) float32
        B, C, H, W = x.shape
        ph, pw = self.patch_size
        pad_h = (ph - H % ph) % ph
        pad_w = (pw - W % pw) % pw
        if pad_h or pad_w:
            # F.pad(x, (0, pad_w, 0, pad_h, 0, 0)): trailing-side pad of W, H.
            x = jnp.pad(x, ((0, 0), (0, 0), (0, pad_h), (0, pad_w)))
            H, W = H + pad_h, W + pad_w
        Hp, Wp = H // ph, W // pw
        # Cast fuses into the single transpose pass that builds channels-last
        # patches (B, Hp, Wp, ph, pw, C); flatten order matches w_mat rows.
        x = x.astype(self.compute_dtype)
        patches = x.reshape(B, C, Hp, ph, Wp, pw)
        patches = jnp.transpose(patches, (0, 2, 4, 3, 5, 1))
        patches = patches.reshape(B * Hp * Wp, C * ph * pw)
        # Hot path: projection on the MXU via Pallas (f32 accumulate, bf16 out).
        tokens = _pallas_patch_proj(patches, self.w_mat, self.bias,
                                    out_dtype=self.compute_dtype)
        tokens = tokens.reshape(B, Hp * Wp, self.embed_dim)
        # norm_layer=None -> Identity.
        return tokens, Hp, Wp


def _reference(x, weight, bias, patch_size):
    """Pure-JAX f32 reference matching PyTorch Conv2d(stride=kernel_size)."""
    ph, pw = patch_size
    B, C, H, W = x.shape
    pad_h = (ph - H % ph) % ph
    pad_w = (pw - W % pw) % pw
    if pad_h or pad_w:
        x = jnp.pad(x, ((0, 0), (0, 0), (0, pad_h), (0, pad_w)))
    y = jax.lax.conv_general_dilated(
        x, weight, window_strides=(ph, pw), padding="VALID",
        dimension_numbers=("NCHW", "OIHW", "NCHW"))
    y = y + bias.reshape(1, -1, 1, 1)
    B2, E, Hp, Wp = y.shape
    y = y.reshape(B2, E, Hp * Wp).transpose(0, 2, 1)
    return y, Hp, Wp


if __name__ == "__main__":
    key = jax.random.PRNGKey(0)
    k_in, k_param = jax.random.split(key)

    B, C, H, W = 2, 4, 16, 16
    patch_size, embed_dim = 4, 32

    x = jax.random.normal(k_in, (B, C, H, W), dtype=jnp.float32)

    # Default (bf16 compute, bf16 output) perf path.
    mod = PatchEmbedPallas(patch_size=patch_size, in_c=C,
                           embed_dim=embed_dim, key=k_param)
    tokens, Hp, Wp = mod(x)
    tokens = jax.block_until_ready(tokens)

    ref, Hr, Wr = _reference(x, mod.weight, mod.bias, mod.patch_size)
    ref = jax.block_until_ready(ref)
    assert (Hp, Wp) == (Hr, Wr)
    assert tokens.shape == (B, Hp * Wp, embed_dim)
    # bf16 inputs + bf16 output, f32 accumulate -> loose tolerance vs f32 conv.
    assert jnp.allclose(tokens.astype(jnp.float32), ref, atol=3e-2, rtol=3e-2)

    # Exact (f32 compute / f32 output) path through the same kernel.
    mod_f32 = PatchEmbedPallas(patch_size=patch_size, in_c=C,
                               embed_dim=embed_dim, key=k_param,
                               compute_dtype=jnp.float32)
    tokens32, _, _ = mod_f32(x)
    tokens32 = jax.block_until_ready(tokens32)
    assert jnp.allclose(tokens32, ref, atol=1e-5, rtol=1e-5)

    print("KERNEL_OK")
</pallas_src>

<mosaic_0001>
module attributes {stable_mosaic.version = 11 : i64} {
  func.func @_proj_kernel(%arg0: i32, %arg1: memref<16x64xbf16, #tpu.memory_space<vmem>>, %arg2: memref<64x32xbf16, #tpu.memory_space<vmem>>, %arg3: memref<1x32xf32, #tpu.memory_space<vmem>>, %arg4: memref<16x32xbf16, #tpu.memory_space<vmem>>) attributes {dimension_semantics = [#tpu.dimension_semantics<parallel>], iteration_bounds = array<i64: 2>, scalar_prefetch = 0 : i64, scratch_operands = 0 : i64, tpu.core_type = #tpu.core_type<tc>, window_params = [{transform_indices = @transform_0, window_bounds = array<i64: 16, 64>}, {pipeline_mode = #tpu.pipeline_mode<synchronous>, transform_indices = @transform_1, window_bounds = array<i64: 64, 32>}, {pipeline_mode = #tpu.pipeline_mode<synchronous>, transform_indices = @transform_2, window_bounds = array<i64: 1, 32>}, {transform_indices = @transform_3, window_bounds = array<i64: 16, 32>}]} {
    %c0 = arith.constant 0 : index
    %c0_0 = arith.constant 0 : index
    %0 = vector.load %arg1[%c0, %c0_0] : memref<16x64xbf16, #tpu.memory_space<vmem>>, vector<16x64xbf16>
    %c0_1 = arith.constant 0 : index
    %c0_2 = arith.constant 0 : index
    %1 = vector.load %arg2[%c0_1, %c0_2] : memref<64x32xbf16, #tpu.memory_space<vmem>>, vector<64x32xbf16>
    %cst = arith.constant dense<0.000000e+00> : vector<16x32xf32>
    %2 = tpu.matmul %0, %1, %cst {dimension_numbers = #tpu.dot_dimension_numbers<[1], [0], [0], [1], [0, 0, 1, 1], [], []>} : vector<16x64xbf16>, vector<64x32xbf16>, vector<16x32xf32> -> vector<16x32xf32>
    %c0_3 = arith.constant 0 : index
    %c0_4 = arith.constant 0 : index
    %3 = vector.load %arg3[%c0_3, %c0_4] : memref<1x32xf32, #tpu.memory_space<vmem>>, vector<1x32xf32>
    %4 = vector.broadcast %3 : vector<1x32xf32> to vector<16x32xf32>
    %5 = arith.addf %2, %4 : vector<16x32xf32>
    %6 = arith.truncf %5 : vector<16x32xf32> to vector<16x32xbf16>
    %c0_5 = arith.constant 0 : index
    %c0_6 = arith.constant 0 : index
    %7 = vector.load %arg4[%c0_5, %c0_6] : memref<16x32xbf16, #tpu.memory_space<vmem>>, vector<16x32xbf16>
    tpu.vector_store %arg4[%c0_5, %c0_6], %6 {strides = array<i32>} : memref<16x32xbf16, #tpu.memory_space<vmem>>, vector<16x32xbf16>,
    return
  }
  func.func @transform_0(%arg0: i32) -> (i32, i32) {
    %c0_i32 = arith.constant 0 : i32
    %c0_i32_0 = arith.constant 0 : i32
    return %arg0, %c0_i32 : i32, i32
  }
  func.func @transform_1(%arg0: i32) -> (i32, i32) {
    %c0_i32 = arith.constant 0 : i32
    %c0_i32_0 = arith.constant 0 : i32
    %c0_i32_1 = arith.constant 0 : i32
    return %c0_i32, %c0_i32_0 : i32, i32
  }
  func.func @transform_2(%arg0: i32) -> (i32, i32) {
    %c0_i32 = arith.constant 0 : i32
    %c0_i32_0 = arith.constant 0 : i32
    %c0_i32_1 = arith.constant 0 : i32
    return %c0_i32, %c0_i32_0 : i32, i32
  }
  func.func @transform_3(%arg0: i32) -> (i32, i32) {
    %c0_i32 = arith.constant 0 : i32
    %c0_i32_0 = arith.constant 0 : i32
    return %arg0, %c0_i32 : i32, i32
  }
}

</mosaic_0001>

<bundles_post_ra>
// kernel: tpu_custom_call.1
= control target key start
LH: loop header
LB: loop body
LE: loop exit
PB: predicated region body
PF: predicated region fallthrough
CT: control target
= control target key end

     0   :  { %8 = vsyncpa [#allocation3], 0  ;;  %s646_s0 = inlined_call_operand.vmem [shape: bf16[32,64], index: 0, kind: input, shape index: {}]   ;;  %s647_s1 = inlined_call_operand.vmem [shape: bf16[64,32], index: 1, kind: input, shape index: {}]   ;;  %s648_s2 = inlined_call_operand.vmem [shape: f32[1,32], index: 2, kind: input, shape index: {}]   ;;  %s649_s3 = inlined_call_operand.hbm [shape: bf16[32,32], index: 3, kind: output, shape index: {}]  }
   0x1   :  { %10 = vsyncpa [#allocation3 + $0x1], 0  ;;  %s529_s12 = smov 0   ;;  %s531_s13 = smov 0  }
   0x2   :  { %s533_s14 = smov 0   ;;  %s535_s15 = smov 0  }
   0x3 LB: > { %s550_s16 = sadd.s32 4294967295, %s502_s15   ;;  %s351_s17 = sadd.s32 4294967294, %s502_s15   ;;  %s502_s15 = sphi %s535_s15, %s655_s15   ;;  %s498_s14 = sphi %s533_s14, %s654_s14   ;;  %s494_s13 = sphi %s531_s13, %s653_s13   ;;  %s490_s12 = sphi %s529_s12, %s652_s12  }
   0x4   : > { %s554_s18 = sadd.s32 1, %s502_s15   ;;  %s91_s19 = sadd.s32 1, %s498_s14 }
   0x5   : > { %s88_s20 = ssub.s32 %s502_s15, %s554_s18  ;;  %p101_p0 = scmp.ne.s32.totalorder %s498_s14, %s494_s13 }
   0x6   : > { %p89_p1 = scmp.eq.s32.totalorder %s88_s20, 0  ;;  %p102_p2 = scmp.eq.s32.totalorder %s550_s16, 1 }
   0x7   : > { %p107_p3 = scmp.ne.s32.totalorder %s494_s13, %s490_s12  ;;  %p108_p4 = scmp.eq.s32.totalorder %s351_s17, 1 }
   0x8   : > { %s565_s21 = scalar_select %p89_p1, %s498_s14, %s91_s19  }
   0x9   : > { %p567_p5 = por %p102_p2, %p101_p0  ;;  %p571_p6 = por %p108_p4, %p107_p3 }
   0xa   : > { %p354_p7 = scmp.ge.s32.totalorder %s502_s15, 1  ;;  %p141_p8 = scmp.lt.s32.totalorder %s502_s15, 3 }
   0xc   : > { %p142_p9 = pnand %p354_p7, %p141_p8 }
   0xd   : > { %v435_v0 = vld [vmem:[%s647_s1] sm:$0xff] (!%p142_p9)   ;;  %v504_v1 = vmov (!%p142_p9), 0.0   ;;  %v436_v2 = vld [vmem:[%s647_s1 + $0x8] sm:$0xff] (!%p142_p9)   ;;  %vm505_vm0 = vmmov (!%p142_p9), 0   ;;  %s356_s28 = sshll.u32 (!%p142_p9), %s550_s16, 1  ;;  %v437_v3 = vld [vmem:[%s647_s1 + $0x10] sm:$0xff] (!%p142_p9)  }
   0xe   : > { %145 = sbr.rel (%p142_p9) target bundleno = 263 (0x107), region = 32  ;;  %380 = vmatprep.subr.bf16.mxu0 (!%p142_p9), %v504_v1  ;;  %388 = vmatprep.mubr.msk.bf16.mxu0 (!%p142_p9), %vm505_vm0, %v504_v1  ;;  %p166_p10 = scmp.lt.s32.totalorder (!%p142_p9), %s356_s28, 3  ;;  %v438_v4 = vld [vmem:[%s647_s1 + $0x18] sm:$0xff] (!%p142_p9)   ;;  %vm219_vm1 = vcmask (!%p142_p9), 523264   ;;  %v358_v6 = vld [vmem:[%s648_s2] ss:$0 sm:$0xff] (!%p142_p9) }
   0xf   : > { %381 = vmatpush3.bf16.msra.mxu0 (!%p142_p9), %v435_v0  ;;  %s162_s10 = sand.u32 (!%p142_p9), 1, %s494_s13   ;;  %s374_s25 = sshll.u32 (!%p142_p9), %s550_s16, 7  ;;  %vm272_vm2 = vcmask (!%p142_p9), 257024  }
  0x10   : > { %382 = vmatprep.subr.bf16.mxu0 (!%p142_p9), %v504_v1  ;;  %s355_s11 = sshll.u32 (!%p142_p9), %s162_s10, 3  ;;  %s605_s29 = scalar_lea.sflag (!%p142_p9), [#allocation3], %s162_s10 }
  0x11   : > { %s164_s20 = scalar_lea.vmem (!%p142_p9), [#allocation2], %s355_s11  ;;  %s506_s30 = smov (!%p142_p9), [#allocation2]  }
  0x12   : > { %s289_s24 = sshll.u32 (!%p142_p9), %s164_s20, 4  ;;  %s598_s24 = int_to_ptr.vmem [resolvable:$true] %s289_s24 }
  0x13   : > { %383 = vmatpush3.bf16.msra.mxu0 (!%p142_p9), %v436_v2  ;;  %s440_s16 = scalar_lea.vmem (!%p142_p9), %s598_s24, 128 }
  0x14   : > { %384 = vmatprep.subr.bf16.mxu0 (!%p142_p9), %v504_v1  ;;  %p441_p11 = scmp.ne.s32.totalorder (!%p142_p9), %s598_s24, %s440_s16 }
  0x15   : > { %s657_s28 = smov (!%p166_p10, %s356_s28), 3 }
  0x16   : > { %s357_s4 = sshll.u32 %s657_s28, 2  ;;  %s603_s28 = scalar_lea.hbm %s649_s3, %s374_s25 }
  0x17   : > { %s169_s7 = scalar_lea.vmem %s646_s0, %s357_s4  ;;  %385 = vmatpush3.bf16.msra.mxu0 %v437_v3  ;;  %p442_p12 = pnand %p441_p11, %p567_p5 }
  0x18   : > { %386 = vmatprep.subr.bf16.mxu0 %v504_v1  ;;  %v439_v5 = vld [vmem:[%s169_s7] sm:$0xff]   ;;  %s444_s4 = sshll.u32 %s506_s30, 4  ;;  %s445_s4 = int_to_ptr.vmem [resolvable:$false] %s444_s4 }
  0x19   : > { %p443_p13 = pneg %p442_p12  ;;  %s446_s5 = scalar_lea.vmem %s445_s4, 256 }
  0x1a   : > { %p447_p0 = scmp.lt.s32.totalorder %s598_s24, %s445_s4  ;;  %p448_p1 = scmp.lt.s32.totalorder %s446_s5, %s440_s16 }
  0x1b   : > { %387 = vmatpush3.bf16.msra.mxu0 %v438_v4 }
  0x1c   : > { %p449_p2 = por %p448_p1, %p447_p0 }
  0x1e   : > { %389 = vmatmul.mubr.msk.bf16.vlgmr.msra.gmra.mrb[0].mxu0 %vm219_vm1, %v439_v5  ;;  %p450_p3 = pnand %p449_p2, %p443_p13 }
  0xf1   : > { %v257_v7 = vpop.f32.mrb[0].mxu0 }
  0xf2   : > { %v258_v8 = vadd.f32 %v358_v6, %v257_v7  ;;  %v390_v9 = vpop.f32.mrb[1].mxu0 }
  0xf3   : > { %v260_v10 = vpop.f32.mrb[2].mxu0 }
  0xf4   : > { %v372_v11 = vpack.c.bf16 %v258_v8, %v258_v8  ;;  %v261_v12 = vadd.f32 %v358_v6, %v260_v10  ;;  %v391_v13 = vpop.f32.mrb[3].mxu0 }
  0xf6   : > { %273 = vst.msk [vmem:[%s164_s20] sm:$0xf] %vm272_vm2, %v372_v11  ;;  %v373_v14 = vpack.c.bf16 %v261_v12, %v261_v12 }
  0xf8   : > { %274 = vst.msk [vmem:[%s164_s20 + $0x4] sm:$0xf] %vm272_vm2, %v373_v14 }
  0xf9   : > { %453 = shalt.err (!%p450_p3)
}
  0xfa   : > { %s454_s6 = scalar_lea.hbm %s603_s28, 128  ;;  %s458_s9 = scalar_lea.hbm %s649_s3, 256 }
  0xfb   : > { %p455_p4 = scmp.ne.s32.totalorder %s603_s28, %s454_s6  ;;  %p459_p9 = scmp.lt.u32.totalorder %s603_s28, %s649_s3 }
  0xfc   : > { %p460_p10 = scmp.lt.u32.totalorder %s458_s9, %s454_s6  ;;  %p462_p12 = scmp.lt.u32.totalorder %s454_s6, %s603_s28 }
  0xfd   : > { %p456_p7 = pnand %p455_p4, %p567_p5 }
  0xfe   : > { %p461_p11 = por %p460_p10, %p459_p9 }
  0xff   : > { %p457_p8 = pneg %p456_p7 }
 0x100   : > { %p463_p13 = por %p462_p12, %p461_p11 }
 0x102   : > { %p464_p0 = pnand %p463_p13, %p457_p8 }
 0x104   : > { %467 = shalt.err (!%p464_p0)
}
 0x105   : > { %s507_s17 = smov 64   ;;  %s508_s19 = smov 4  }
 0x106   : > { %392 = dma.vmem_to_hbm [thread:$0]  (%p567_p5), %s598_s24, 128, %s603_s28, %s605_s29, %s507_s17, %s507_s17, %s508_s19  }
 0x107 PF: > { %p398_p1 = scmp.ge.s32.totalorder %s502_s15, 2  ;;  %s304_s20 = sand.u32 1, %s490_s12  }
 0x108   : > { %s305_s25 = scalar_lea.sflag [#allocation3], %s304_s20 }
 0x109   : > { %p395_p2 = pnand %p398_p1, %p571_p6 }
 0x10b   : > { %485 = dma.done.wait (!%p395_p2), %s305_s25, 128  }
 0x10c   : > { %487 = vsyncadd (!%p395_p2), %s305_s25, 4294967168  ;;  %p13_p3 = scmp.ge.s32.totalorder %s554_s18, 4   ;;  %s652_s12 = smov %s494_s13 }
 0x10d   : > { %s653_s13 = smov %s498_s14  ;;  %s654_s14 = smov %s565_s21 }
 0x10e   : > { %s655_s15 = smov %s554_s18  ;;  %15 = sbr.rel (!%p13_p3) target bundleno = 3 (0x3), region = 67 }
 0x115   :  { %310 = vsyncpa [#allocation3], 1 }
 0x116   :  { %312 = vsyncpa [#allocation3 + $0x1], 1 }

</bundles_post_ra>
